<compile_context>
chip_gen: v6e
topology: v6e:2x2x1
jax: 0.10.0
libtpu: 0.0.40
codegen_flags: <defaults>
</compile_context>

<pallas_src>
import numpy as np
import jax
import jax.numpy as jnp
from jax import lax
from jax.experimental import pallas as pl
from jax.experimental.pallas import tpu as pltpu

NC_PAD = 128        # lane-dense class dimension
NEG_BIG = -1e30     # "minus infinity" that is safe in f32 adds


def _round_up(x, m):
    return (x + m - 1) // m * m


# --------------------------------------------------------------------------
# kernel
# --------------------------------------------------------------------------
def _margin_kernel(x_ref, tgt_ref, w1_ref, b1_ref, w2_ref, b2_ref,
                   logits_ref, grad_ref):
    x = x_ref[...]                                   # [TB, Dp]  bf16
    tgt = tgt_ref[...]                               # [TB, 1]   int32

    # --- forward: Linear -> ReLU -> Linear (bf16 MXU operands, f32 accum) ---
    z1 = jnp.dot(x, w1_ref[...], preferred_element_type=jnp.float32) + b1_ref[...]
    a1 = jnp.maximum(z1, 0.0)                                             # [TB, Hd]
    logits = jnp.dot(a1.astype(jnp.bfloat16), w2_ref[...],
                     preferred_element_type=jnp.float32) + b2_ref[...]    # [TB, 128]
    logits_ref[...] = logits

    # --- d margin / d logits  (margin = max_{j != y} logit_j - logit_y) ----
    # One-hot built in-kernel from the int32 target column (no f32 onehot DMA).
    cls = lax.broadcasted_iota(jnp.int32, logits.shape, 1)                # [TB, 128]
    is_target = cls == tgt
    onehot = is_target.astype(jnp.float32)
    masked = jnp.where(is_target, jnp.float32(NEG_BIG), logits)
    other_max = jnp.max(masked, axis=-1, keepdims=True)                   # [TB, 1]
    is_om = masked >= other_max
    # Single-argmax subgradient: pick the FIRST maximal "other" index (exact,
    # matches torch.max tie-breaking; no approx reciprocal).
    cls_f = cls.astype(jnp.float32)
    first_idx = jnp.min(jnp.where(is_om, cls_f, jnp.float32(NC_PAD)),
                        axis=-1, keepdims=True)                           # [TB, 1]
    dlogits = (cls_f == first_idx).astype(jnp.float32) - onehot           # [TB, 128]

    # --- backprop through the two Linears -----------------------------------
    # Contract on the weights' 2nd axis (a @ b^T on the MXU) -> no transposed
    # weight copies have to be kept resident in VMEM.
    da1 = lax.dot_general(dlogits.astype(jnp.bfloat16), w2_ref[...],
                          (((1,), (1,)), ((), ())),
                          preferred_element_type=jnp.float32)             # [TB, Hd]
    dz1 = jnp.where(z1 > 0.0, da1, 0.0)
    grad = lax.dot_general(dz1.astype(jnp.bfloat16), w1_ref[...],
                           (((1,), (1,)), ((), ())),
                           preferred_element_type=jnp.float32)            # [TB, Dp]
    grad_ref[...] = grad.astype(jnp.bfloat16)


# --------------------------------------------------------------------------
# tiling / VMEM heuristics
# --------------------------------------------------------------------------
def _vmem_capacity_bytes():
    try:
        info = pltpu.get_tpu_info()
        for attr in ("vmem_capacity_bytes", "vmem_bytes", "vmem_size_bytes"):
            v = getattr(info, attr, None)
            if v:
                return int(v)
    except Exception:
        pass
    return 64 * 1024 * 1024  # conservative (v7x per-TC)


def _choose_tile_and_limit(B, d_pad, hd):
    cap = _vmem_capacity_bytes()
    # Resident weights / biases (single-buffered via pl.Buffered(1)).
    weights = d_pad * hd * 2 + hd * NC_PAD * 2 + (hd + NC_PAD) * 4
    # Per-row bytes that scale with the batch tile:
    #   double-buffered streams: x(bf16) + grad(bf16) + logits(f32) + target(i32)
    stream_row = 2 * (2 * d_pad + 2 * d_pad + 4 * NC_PAD + 4)
    #   in-kernel f32 temporaries (grad accum + hidden/class activations)
    temp_row = 4 * d_pad + 16 * hd + 16 * NC_PAD
    per_row = stream_row + temp_row

    budget = int(cap * 0.6) - weights
    tb = (max(budget, 0) // per_row) // 16 * 16
    tb = max(16, min(512, tb))                      # 512 already ~85% of HBM roofline
    tb = min(tb, max(16, _round_up(B, 16)))         # don't over-pad tiny batches
    # Ensure >= 2 grid steps when B allows it, so v7x's two TCs both get work
    # and the input/output pipeline actually double-buffers.
    half_b = (_round_up(B, 16) // 2) // 16 * 16
    if half_b >= 16:
        tb = min(tb, half_b)

    need = weights + tb * per_row
    vmem_limit = min(int(cap * 0.75),
                     max(32 * 1024 * 1024, int(need * 13 // 10)))
    return tb, vmem_limit


# --------------------------------------------------------------------------
# wrapper
# --------------------------------------------------------------------------
def prepare_margin_params(params, x_shape):
    """One-time preprocessing of the 2-layer MLP params.

    Cache the result across training steps: it pads/casts the step-invariant
    weights so the per-step forward call does no weight-side HBM passes.
    """
    w1, b1, w2, b2 = params
    D = int(np.prod(x_shape[1:]))
    Hd = w1.shape[1]
    NC = w2.shape[1]
    assert NC <= NC_PAD
    D_pad = _round_up(D, 128)

    if D_pad == D:
        w1_bf = w1.astype(jnp.bfloat16)
    else:
        w1_bf = jnp.zeros((D_pad, Hd), jnp.bfloat16).at[:D].set(w1.astype(jnp.bfloat16))
    b1_f = b1.reshape(1, Hd).astype(jnp.float32)
    w2_bf = jnp.zeros((Hd, NC_PAD), jnp.bfloat16).at[:, :NC].set(w2.astype(jnp.bfloat16))
    # padded bias columns = -1e30 so padded classes can never win the max
    b2_f = jnp.full((1, NC_PAD), NEG_BIG, jnp.float32).at[:, :NC].set(
        b2.reshape(1, NC).astype(jnp.float32))
    return {"w1": w1_bf, "b1": b1_f, "w2": w2_bf, "b2": b2_f,
            "D": D, "D_pad": D_pad, "Hd": Hd, "NC": NC}


def margin_with_sample_forward(x_nchw, prepared, target, *, epoch, conf):
    """Pallas implementation of MarginWithSampleNetwork.forward (fused hot path)."""
    B = x_nchw.shape[0]
    D, D_pad, Hd, NC = prepared["D"], prepared["D_pad"], prepared["Hd"], prepared["NC"]
    assert int(np.prod(x_nchw.shape[1:])) == D

    # eps schedules (mirrors __init__ / forward of the module)
    eps_correct_sched = np.linspace(conf["eps"], conf["eps_correct_end"],
                                    conf["eps_correct_epoch"])
    eps_wrong_sched = np.linspace(conf["eps_wrong"], conf["eps_wrong_end"],
                                  conf["eps_wrong_epoch"])
    eps_correct = float(eps_correct_sched[min(epoch, conf["eps_correct_epoch"] - 1)])
    eps_wrong = float(eps_wrong_sched[min(epoch, conf["eps_wrong_epoch"] - 1)])
    correct_weight = float(conf["correct_weight"])

    TB, vmem_limit = _choose_tile_and_limit(B, D_pad, Hd)
    B_pad = _round_up(B, TB)

    # --- input streams (avoid extra padded copies when not needed) ---------
    x_bf = x_nchw.reshape(B, D).astype(jnp.bfloat16)
    if B_pad == B and D_pad == D:
        x_pad = x_bf
    elif D_pad == D:
        x_pad = jnp.pad(x_bf, ((0, B_pad - B), (0, 0)))
    else:
        x_pad = jnp.zeros((B_pad, D_pad), jnp.bfloat16).at[:B, :D].set(x_bf)

    tgt_col = target.astype(jnp.int32).reshape(B, 1)
    tgt_pad = tgt_col if B_pad == B else jnp.pad(tgt_col, ((0, B_pad - B), (0, 0)))

    grid = (B_pad // TB,)
    res_map = lambda i: (0, 0)

    def resident(shape):
        # constant index_map -> single buffer is enough (no re-DMA per step)
        return pl.BlockSpec(shape, res_map, pipeline_mode=pl.Buffered(1))

    logits_pad, grad_pad = pl.pallas_call(
        _margin_kernel,
        out_shape=(
            jax.ShapeDtypeStruct((B_pad, NC_PAD), jnp.float32),   # logits
            jax.ShapeDtypeStruct((B_pad, D_pad), jnp.bfloat16),   # d margin / d x
        ),
        grid=grid,
        in_specs=[
            pl.BlockSpec((TB, D_pad), lambda i: (i, 0)),     # x
            pl.BlockSpec((TB, 1), lambda i: (i, 0)),         # target column
            resident((D_pad, Hd)),                           # w1
            resident((1, Hd)),                               # b1
            resident((Hd, NC_PAD)),                          # w2
            resident((1, NC_PAD)),                           # b2
        ],
        out_specs=(
            pl.BlockSpec((TB, NC_PAD), lambda i: (i, 0)),
            pl.BlockSpec((TB, D_pad), lambda i: (i, 0)),
        ),
        compiler_params=pltpu.CompilerParams(
            dimension_semantics=("parallel",),
            vmem_limit_bytes=vmem_limit),
    )(x_pad, tgt_pad, prepared["w1"], prepared["b1"], prepared["w2"], prepared["b2"])

    # --- cheap per-sample scalars derived in the wrapper (plain jnp ops) ----
    # NOTE: padded rows (B..B_pad) / padded class columns of logits_pad /
    # grad_pad contain meaningless values; they are sliced away here.
    logits = logits_pad[:B, :NC]
    oh = jax.nn.one_hot(target, NC, dtype=jnp.float32)
    masked = jnp.where(oh > 0, -jnp.inf, logits)
    other_max = jnp.max(masked, axis=-1, keepdims=True)
    target_logit = jnp.sum(logits * oh, axis=-1, keepdims=True)
    margin = other_max - target_logit                                    # [B, 1]
    correct = margin[:, 0] < 0.0                                         # bool [B]
    cf = correct.astype(jnp.float32)
    eps = eps_correct * cf + eps_wrong * (1.0 - cf)
    weight = correct_weight * cf + 1.0 * (1.0 - cf)

    # grad kept in bfloat16 (kernel is HBM-bound; the largest write stream).
    grad = grad_pad[:B, :D].reshape(x_nchw.shape)

    # debug stats kept as device arrays (no host sync per step)
    debug = {
        "eps_correct": [eps_correct],
        "eps_wrong": [eps_wrong],
        "imgs_values_mean": [jnp.mean(margin)],
        "imgs_values_max": [jnp.max(margin)],
        "imgs_values_min": [jnp.min(margin)],
    }

    # TODO(synk): project_points (iterative level-set projection, nb_iter grad
    # steps) comes from an unspecified external class; not reproduced.
    # TODO(synk): SampleNetwork (implicit-differentiation re-sampling of the
    # level-set points) is an external module; not reproduced.
    # TODO(synk): boolean-mask indexing by projection_result['sign_changed']
    # yields data-dependent shapes; returning unfiltered per-sample tensors.
    return {
        "network_eval_on_levelset_points": margin,       # eval = margin(f(x), y)
        "zero_pnts_grad": grad,                          # levelset_points_Dx (bf16)
        "correct": correct,
        "eps": eps.reshape(B, 1, 1, 1),                  # .view(n, 1, 1, 1)
        "weight": weight,
        "logits": logits,
        "debug": debug,
    }


# --------------------------------------------------------------------------
# reference + test
# --------------------------------------------------------------------------
def _init_params(key, D, Hd, NC):
    k1, k2, k3, k4 = jax.random.split(key, 4)
    w1 = jax.random.normal(k1, (D, Hd), jnp.float32) * (1.0 / np.sqrt(D))
    b1 = jax.random.normal(k2, (Hd,), jnp.float32) * 0.01
    w2 = jax.random.normal(k3, (Hd, NC), jnp.float32) * (1.0 / np.sqrt(Hd))
    b2 = jax.random.normal(k4, (NC,), jnp.float32) * 0.01
    return w1, b1, w2, b2


def _reference_forward(x_flat, params, target, nc):
    """Plain-JAX reference with matching bf16 matmul operands / f32 accumulation."""
    w1, b1, w2, b2 = params
    xb = x_flat.astype(jnp.bfloat16)
    z1 = jnp.dot(xb, w1.astype(jnp.bfloat16),
                 preferred_element_type=jnp.float32) + b1.reshape(1, -1)
    a1 = jnp.maximum(z1, 0.0)
    logits = jnp.dot(a1.astype(jnp.bfloat16), w2.astype(jnp.bfloat16),
                     preferred_element_type=jnp.float32) + b2.reshape(1, -1)
    oh = jax.nn.one_hot(target, nc, dtype=jnp.float32)
    masked = jnp.where(oh > 0, -jnp.inf, logits)
    other_max = jnp.max(masked, axis=-1, keepdims=True)
    margin = other_max - jnp.sum(logits * oh, axis=-1, keepdims=True)
    other_idx = jnp.argmax(masked, axis=-1)                 # first maximal index
    dlogits = jax.nn.one_hot(other_idx, nc, dtype=jnp.float32) - oh
    da1 = jnp.dot(dlogits.astype(jnp.bfloat16), w2.astype(jnp.bfloat16).T,
                  preferred_element_type=jnp.float32)
    dz1 = jnp.where(z1 > 0.0, da1, 0.0)
    grad = jnp.dot(dz1.astype(jnp.bfloat16), w1.astype(jnp.bfloat16).T,
                   preferred_element_type=jnp.float32)
    return logits, margin, grad


if __name__ == "__main__":
    B, C, H, W = 2, 4, 16, 16
    Hd, NC = 128, 10
    D = C * H * W

    key = jax.random.PRNGKey(0)
    kx, kt, kp = jax.random.split(key, 3)
    x = jax.random.normal(kx, (B, C, H, W), jnp.float32)
    target = jax.random.randint(kt, (B,), 0, NC)
    params = _init_params(kp, D, Hd, NC)

    conf = {
        "eps": 0.3, "eps_correct_end": 0.1, "eps_correct_epoch": 10,
        "eps_wrong": 0.1, "eps_wrong_end": 0.05, "eps_wrong_epoch": 10,
        "correct_weight": 2.0,
    }

    # Weight preprocessing is step-invariant: do it once and reuse every step.
    prepared = prepare_margin_params(params, x.shape)

    out = margin_with_sample_forward(x, prepared, target, epoch=3, conf=conf)
    jax.block_until_ready(out)

    # sanity check against plain-JAX reference (same bf16 operand casts)
    logits_r, margin_r, grad_r = _reference_forward(x.reshape(B, D), params, target, NC)
    assert jnp.allclose(out["logits"], logits_r, atol=5e-3, rtol=5e-3), "logits mismatch"
    assert jnp.allclose(out["network_eval_on_levelset_points"], margin_r,
                        atol=5e-3, rtol=5e-3), "margin mismatch"
    grad_k = out["zero_pnts_grad"].astype(jnp.float32).reshape(B, D)
    assert jnp.allclose(grad_k, grad_r, atol=2e-2, rtol=2e-2), "grad mismatch"

    print("KERNEL_OK")
</pallas_src>

<mosaic_0001>
module attributes {stable_mosaic.version = 11 : i64} {
  func.func @_margin_kernel(%arg0: i32, %arg1: memref<16x1024xbf16, #tpu.memory_space<vmem>>, %arg2: memref<16x1xi32, #tpu.memory_space<vmem>>, %arg3: memref<1024x128xbf16, #tpu.memory_space<vmem>>, %arg4: memref<1x128xf32, #tpu.memory_space<vmem>>, %arg5: memref<128x128xbf16, #tpu.memory_space<vmem>>, %arg6: memref<1x128xf32, #tpu.memory_space<vmem>>, %arg7: memref<16x128xf32, #tpu.memory_space<vmem>>, %arg8: memref<16x1024xbf16, #tpu.memory_space<vmem>>) attributes {dimension_semantics = [#tpu.dimension_semantics<parallel>], iteration_bounds = array<i64: 1>, scalar_prefetch = 0 : i64, scratch_operands = 0 : i64, tpu.core_type = #tpu.core_type<tc>, window_params = [{transform_indices = @transform_0, window_bounds = array<i64: 16, 1024>}, {transform_indices = @transform_1, window_bounds = array<i64: 16, 1>}, {pipeline_mode = #tpu.pipeline_mode<synchronous>, transform_indices = @transform_2, window_bounds = array<i64: 1024, 128>}, {pipeline_mode = #tpu.pipeline_mode<synchronous>, transform_indices = @transform_3, window_bounds = array<i64: 1, 128>}, {pipeline_mode = #tpu.pipeline_mode<synchronous>, transform_indices = @transform_4, window_bounds = array<i64: 128, 128>}, {pipeline_mode = #tpu.pipeline_mode<synchronous>, transform_indices = @transform_5, window_bounds = array<i64: 1, 128>}, {transform_indices = @transform_6, window_bounds = array<i64: 16, 128>}, {transform_indices = @transform_7, window_bounds = array<i64: 16, 1024>}]} {
    %c0 = arith.constant 0 : index
    %c0_0 = arith.constant 0 : index
    %0 = vector.load %arg1[%c0, %c0_0] : memref<16x1024xbf16, #tpu.memory_space<vmem>>, vector<16x1024xbf16>
    %c0_1 = arith.constant 0 : index
    %c0_2 = arith.constant 0 : index
    %1 = vector.load %arg2[%c0_1, %c0_2] : memref<16x1xi32, #tpu.memory_space<vmem>>, vector<16x1xi32>
    %c0_3 = arith.constant 0 : index
    %c0_4 = arith.constant 0 : index
    %2 = vector.load %arg3[%c0_3, %c0_4] : memref<1024x128xbf16, #tpu.memory_space<vmem>>, vector<1024x128xbf16>
    %cst = arith.constant dense<0.000000e+00> : vector<16x128xf32>
    %3 = tpu.matmul %0, %2, %cst {dimension_numbers = #tpu.dot_dimension_numbers<[1], [0], [0], [1], [0, 0, 1, 1], [], []>} : vector<16x1024xbf16>, vector<1024x128xbf16>, vector<16x128xf32> -> vector<16x128xf32>
    %c0_5 = arith.constant 0 : index
    %c0_6 = arith.constant 0 : index
    %4 = vector.load %arg4[%c0_5, %c0_6] : memref<1x128xf32, #tpu.memory_space<vmem>>, vector<1x128xf32>
    %5 = vector.broadcast %4 : vector<1x128xf32> to vector<16x128xf32>
    %6 = arith.addf %3, %5 : vector<16x128xf32>
    %cst_7 = arith.constant 0.000000e+00 : f32
    %7 = vector.broadcast %cst_7 : f32 to vector<16x128xf32>
    %8 = arith.maximumf %6, %7 : vector<16x128xf32>
    %9 = arith.truncf %8 : vector<16x128xf32> to vector<16x128xbf16>
    %c0_8 = arith.constant 0 : index
    %c0_9 = arith.constant 0 : index
    %10 = vector.load %arg5[%c0_8, %c0_9] : memref<128x128xbf16, #tpu.memory_space<vmem>>, vector<128x128xbf16>
    %cst_10 = arith.constant dense<0.000000e+00> : vector<16x128xf32>
    %11 = tpu.matmul %9, %10, %cst_10 {dimension_numbers = #tpu.dot_dimension_numbers<[1], [0], [0], [1], [0, 0, 1, 1], [], []>} : vector<16x128xbf16>, vector<128x128xbf16>, vector<16x128xf32> -> vector<16x128xf32>
    %c0_11 = arith.constant 0 : index
    %c0_12 = arith.constant 0 : index
    %12 = vector.load %arg6[%c0_11, %c0_12] : memref<1x128xf32, #tpu.memory_space<vmem>>, vector<1x128xf32>
    %13 = vector.broadcast %12 : vector<1x128xf32> to vector<16x128xf32>
    %14 = arith.addf %11, %13 : vector<16x128xf32>
    %c0_13 = arith.constant 0 : index
    %c0_14 = arith.constant 0 : index
    %15 = vector.load %arg7[%c0_13, %c0_14] : memref<16x128xf32, #tpu.memory_space<vmem>>, vector<16x128xf32>
    tpu.vector_store %arg7[%c0_13, %c0_14], %14 {strides = array<i32>} : memref<16x128xf32, #tpu.memory_space<vmem>>, vector<16x128xf32>,
    %16 = tpu.iota {dimensions = array<i32: 1>} : vector<16x128xi32>
    %17 = vector.broadcast %1 : vector<16x1xi32> to vector<16x128xi32>
    %18 = arith.cmpi eq, %16, %17 : vector<16x128xi32>
    %19 = arith.extui %18 : vector<16x128xi1> to vector<16x128xi32>
    %20 = arith.sitofp %19 : vector<16x128xi32> to vector<16x128xf32>
    %cst_15 = arith.constant -1.000000e+30 : f32
    %21 = vector.broadcast %cst_15 : f32 to vector<16x128xf32>
    %22 = arith.select %18, %21, %14 : vector<16x128xi1>, vector<16x128xf32>
    %cst_16 = arith.constant dense<0xFF800000> : vector<16xf32>
    %23 = vector.multi_reduction <maximumf>, %22, %cst_16 [1] : vector<16x128xf32> to vector<16xf32>
    %24 = vector.shape_cast %23 : vector<16xf32> to vector<16x1xf32>
    %25 = vector.broadcast %24 : vector<16x1xf32> to vector<16x128xf32>
    %26 = arith.cmpf oge, %22, %25 : vector<16x128xf32>
    %27 = arith.sitofp %16 : vector<16x128xi32> to vector<16x128xf32>
    %cst_17 = arith.constant 1.280000e+02 : f32
    %28 = vector.broadcast %cst_17 : f32 to vector<16x128xf32>
    %29 = arith.select %26, %27, %28 : vector<16x128xi1>, vector<16x128xf32>
    %cst_18 = arith.constant dense<0x7F800000> : vector<16xf32>
    %30 = vector.multi_reduction <minimumf>, %29, %cst_18 [1] : vector<16x128xf32> to vector<16xf32>
    %31 = vector.shape_cast %30 : vector<16xf32> to vector<16x1xf32>
    %32 = vector.broadcast %31 : vector<16x1xf32> to vector<16x128xf32>
    %33 = arith.cmpf oeq, %27, %32 : vector<16x128xf32>
    %34 = arith.extui %33 : vector<16x128xi1> to vector<16x128xi32>
    %35 = arith.sitofp %34 : vector<16x128xi32> to vector<16x128xf32>
    %36 = arith.subf %35, %20 : vector<16x128xf32>
    %37 = arith.truncf %36 : vector<16x128xf32> to vector<16x128xbf16>
    %c0_19 = arith.constant 0 : index
    %c0_20 = arith.constant 0 : index
    %38 = vector.load %arg5[%c0_19, %c0_20] : memref<128x128xbf16, #tpu.memory_space<vmem>>, vector<128x128xbf16>
    %cst_21 = arith.constant dense<0.000000e+00> : vector<16x128xf32>
    %39 = tpu.matmul %37, %38, %cst_21 {dimension_numbers = #tpu.dot_dimension_numbers<[1], [1], [0], [0], [0, 0, 1, 0], [], []>} : vector<16x128xbf16>, vector<128x128xbf16>, vector<16x128xf32> -> vector<16x128xf32>
    %cst_22 = arith.constant 0.000000e+00 : f32
    %40 = vector.broadcast %cst_22 : f32 to vector<16x128xf32>
    %41 = arith.cmpf ogt, %6, %40 : vector<16x128xf32>
    %cst_23 = arith.constant 0.000000e+00 : f32
    %42 = vector.broadcast %cst_23 : f32 to vector<16x128xf32>
    %43 = arith.select %41, %39, %42 : vector<16x128xi1>, vector<16x128xf32>
    %44 = arith.truncf %43 : vector<16x128xf32> to vector<16x128xbf16>
    %c0_24 = arith.constant 0 : index
    %c0_25 = arith.constant 0 : index
    %45 = vector.load %arg3[%c0_24, %c0_25] : memref<1024x128xbf16, #tpu.memory_space<vmem>>, vector<1024x128xbf16>
    %cst_26 = arith.constant dense<0.000000e+00> : vector<16x1024xf32>
    %46 = tpu.matmul %44, %45, %cst_26 {dimension_numbers = #tpu.dot_dimension_numbers<[1], [1], [0], [0], [0, 0, 1, 0], [], []>} : vector<16x128xbf16>, vector<1024x128xbf16>, vector<16x1024xf32> -> vector<16x1024xf32>
    %47 = arith.truncf %46 : vector<16x1024xf32> to vector<16x1024xbf16>
    %c0_27 = arith.constant 0 : index
    %c0_28 = arith.constant 0 : index
    %48 = vector.load %arg8[%c0_27, %c0_28] : memref<16x1024xbf16, #tpu.memory_space<vmem>>, vector<16x1024xbf16>
    tpu.vector_store %arg8[%c0_27, %c0_28], %47 {strides = array<i32>} : memref<16x1024xbf16, #tpu.memory_space<vmem>>, vector<16x1024xbf16>,
    return
  }
  func.func @transform_0(%arg0: i32) -> (i32, i32) {
    %c0_i32 = arith.constant 0 : i32
    %c0_i32_0 = arith.constant 0 : i32
    return %arg0, %c0_i32 : i32, i32
  }
  func.func @transform_1(%arg0: i32) -> (i32, i32) {
    %c0_i32 = arith.constant 0 : i32
    %c0_i32_0 = arith.constant 0 : i32
    return %arg0, %c0_i32 : i32, i32
  }
  func.func @transform_2(%arg0: i32) -> (i32, i32) {
    %c0_i32 = arith.constant 0 : i32
    %c0_i32_0 = arith.constant 0 : i32
    %c0_i32_1 = arith.constant 0 : i32
    return %c0_i32, %c0_i32_0 : i32, i32
  }
  func.func @transform_3(%arg0: i32) -> (i32, i32) {
    %c0_i32 = arith.constant 0 : i32
    %c0_i32_0 = arith.constant 0 : i32
    %c0_i32_1 = arith.constant 0 : i32
    return %c0_i32, %c0_i32_0 : i32, i32
  }
  func.func @transform_4(%arg0: i32) -> (i32, i32) {
    %c0_i32 = arith.constant 0 : i32
    %c0_i32_0 = arith.constant 0 : i32
    %c0_i32_1 = arith.constant 0 : i32
    return %c0_i32, %c0_i32_0 : i32, i32
  }
  func.func @transform_5(%arg0: i32) -> (i32, i32) {
    %c0_i32 = arith.constant 0 : i32
    %c0_i32_0 = arith.constant 0 : i32
    %c0_i32_1 = arith.constant 0 : i32
    return %c0_i32, %c0_i32_0 : i32, i32
  }
  func.func @transform_6(%arg0: i32) -> (i32, i32) {
    %c0_i32 = arith.constant 0 : i32
    %c0_i32_0 = arith.constant 0 : i32
    return %arg0, %c0_i32 : i32, i32
  }
  func.func @transform_7(%arg0: i32) -> (i32, i32) {
    %c0_i32 = arith.constant 0 : i32
    %c0_i32_0 = arith.constant 0 : i32
    return %arg0, %c0_i32 : i32, i32
  }
}

</mosaic_0001>

<bundles_post_ra>
// kernel: tpu_custom_call.1
= control target key start
LH: loop header
LB: loop body
LE: loop exit
PB: predicated region body
PF: predicated region fallthrough
CT: control target
= control target key end

     0   :  { %13 = vsyncpa [#allocation3], 0  ;;  %s2674_s0 = inlined_call_operand.hbm [shape: bf16[16,1024], index: 0, kind: input, shape index: {}]   ;;  %s2675_s1 = inlined_call_operand.vmem [shape: s32[16,1], index: 1, kind: input, shape index: {}]   ;;  %s2676_s2 = inlined_call_operand.hbm [shape: bf16[1024,128], index: 2, kind: input, shape index: {}]   ;;  %s2677_s3 = inlined_call_operand.vmem [shape: f32[1,128], index: 3, kind: input, shape index: {}]   ;;  %s2678_s4 = inlined_call_operand.hbm [shape: bf16[128,128], index: 4, kind: input, shape index: {}]   ;;  %s2679_s5 = inlined_call_operand.vmem [shape: f32[1,128], index: 5, kind: input, shape index: {}]   ;;  %s2680_s6 = inlined_call_operand.hbm [shape: f32[16,128], index: 6, kind: output, shape index: {0}]   ;;  %s2681_s7 = inlined_call_operand.hbm [shape: bf16[16,1024], index: 7, kind: output, shape index: {1}]  }
   0x1   :  { %14 = vsyncpa [#allocation6], 0 }
   0x2   :  { %15 = vsyncpa [#allocation4], 0 }
   0x3   :  { %16 = vsyncpa [#allocation10], 0  ;;  %s2512_s24 = smov [#allocation5]  }
   0x4   :  { %s36_s25 = sshll.u32 %s2512_s24, 4  ;;  %s37_s25 = int_to_ptr.vmem [resolvable:$true] %s36_s25 }
   0x5   :  { %s2412_s26 = scalar_lea.vmem %s37_s25, 8192  ;;  %p2417_p1 = scmp.lt.s32.totalorder %s37_s25, %s37_s25 }
   0x6   :  { %p2413_p0 = scmp.ne.s32.totalorder %s37_s25, %s2412_s26  ;;  %p2418_p2 = scmp.lt.s32.totalorder %s2412_s26, %s2412_s26 }
   0x8   :  { %p2419_p3 = por %p2418_p2, %p2417_p1 }
   0xa   :  { %p2420_p4 = pnand %p2419_p3, %p2413_p0 }
   0xc   :  { %2423 = shalt.err (!%p2420_p4)
}
   0xd   :  { %s2513_s27 = smov 64   ;;  %s2514_s28 = smov 4  }
   0xe   :  { %42 = dma.hbm_to_vmem [thread:$0]  %s2676_s2, 8192, %s37_s25, [#allocation6], %s2513_s27, %s2513_s27, %s2514_s28  }
   0xf   :  { %s2515_s8 = smov [#allocation2]  }
  0x10   :  { %s22_s9 = sshll.u32 %s2515_s8, 4  ;;  %s23_s9 = int_to_ptr.vmem [resolvable:$true] %s22_s9 }
  0x11   :  { %s2432_s10 = scalar_lea.vmem %s23_s9, 1024  ;;  %p2437_p6 = scmp.lt.s32.totalorder %s23_s9, %s23_s9 }
  0x12   :  { %p2433_p5 = scmp.ne.s32.totalorder %s23_s9, %s2432_s10  ;;  %p2438_p7 = scmp.lt.s32.totalorder %s2432_s10, %s2432_s10 }
  0x14   :  { %p2439_p8 = por %p2438_p7, %p2437_p6 }
  0x16   :  { %p2440_p9 = pnand %p2439_p8, %p2433_p5 }
  0x18   :  { %2443 = shalt.err (!%p2440_p9)
}
  0x19   :  { %s2516_s11 = smov 512   ;;  %s2517_s12 = smov 32  }
  0x1a   :  { %28 = dma.hbm_to_vmem [thread:$0]  %s2674_s0, 1024, %s23_s9, [#allocation3], %s2516_s11, %s2516_s11, %s2517_s12  }
  0x1b   :  { %s2518_s2 = smov [#allocation7]  }
  0x1c   :  { %s50_s15 = sshll.u32 %s2518_s2, 4  ;;  %s51_s15 = int_to_ptr.vmem [resolvable:$true] %s50_s15 }
  0x1d   :  { %s2452_s16 = scalar_lea.vmem %s51_s15, 1024  ;;  %p2457_p11 = scmp.lt.s32.totalorder %s51_s15, %s51_s15 }
  0x1e   :  { %p2453_p10 = scmp.ne.s32.totalorder %s51_s15, %s2452_s16  ;;  %p2458_p12 = scmp.lt.s32.totalorder %s2452_s16, %s2452_s16 }
  0x20   :  { %p2459_p13 = por %p2458_p12, %p2457_p11 }
  0x22   :  { %p2460_p0 = pnand %p2459_p13, %p2453_p10 }
  0x24   :  { %2463 = shalt.err (!%p2460_p0)
}
  0x25   :  { %56 = dma.hbm_to_vmem [thread:$0]  %s2678_s4, 1024, %s51_s15, [#allocation6], %s2513_s27, %s2513_s27, %s2514_s28  }
  0x26   :  { %2504 = dma.done.wait [#allocation3], 1024  }
  0x27   :  { %2505 = vsyncadd [#allocation3], 4294966272 }
  0x28   :  { %2506 = dma.done.wait [#allocation6], 9216  }
  0x29   :  { %2507 = vsyncadd [#allocation6], 4294958080  ;;  %v2260_v0 = vld [vmem:[#allocation5 + $0x78] sm:$0xff]   ;;  %v2264_v4 = vld [vmem:[#allocation5 + $0x70] sm:$0xff]   ;;  %vm2520_vm0 = vmmov 0  }
  0x2a   :  { %v2261_v1 = vld [vmem:[#allocation5 + $0xf8] sm:$0xff]   ;;  %2027 = vmatprep.subr.bf16.mxu0 %v2260_v0  ;;  %v2265_v5 = vld [vmem:[#allocation5 + $0xf0] sm:$0xff]   ;;  %v2268_v8 = vld [vmem:[#allocation5 + $0x68] sm:$0xff]  }
  0x2b   :  { %v2262_v2 = vld [vmem:[#allocation5 + $0x38] sm:$0xff]   ;;  %2049 = vmatprep.subr.bf16.mxu1 %v2261_v1  ;;  %v2266_v6 = vld [vmem:[#allocation5 + $0x30] sm:$0xff]   ;;  %v2269_v9 = vld [vmem:[#allocation5 + $0xe8] sm:$0xff]  }
  0x2c   :  { %v2263_v3 = vld [vmem:[#allocation5 + $0xb8] sm:$0xff]   ;;  %2028 = vmatpush3.bf16.msra.mxu0 %v2262_v2  ;;  %v2267_v7 = vld [vmem:[#allocation5 + $0xb0] sm:$0xff]   ;;  %v2270_v10 = vld [vmem:[#allocation5 + $0x28] sm:$0xff]  }
  0x2d   :  { %2050 = vmatpush3.bf16.msra.mxu1 %v2263_v3  ;;  %2029 = vmatprep.subr.bf16.mxu0 %v2264_v4  ;;  %v2271_v11 = vld [vmem:[#allocation5 + $0xa8] sm:$0xff]   ;;  %v2272_v12 = vld [vmem:[#allocation5 + $0x60] sm:$0xff]   ;;  %v2276_v16 = vld [vmem:[#allocation5 + $0x58] sm:$0xff]  }
  0x2e   :  { %2051 = vmatprep.subr.bf16.mxu1 %v2265_v5  ;;  %v2273_v13 = vld [vmem:[#allocation5 + $0xe0] sm:$0xff]   ;;  %v2277_v17 = vld [vmem:[#allocation5 + $0xd8] sm:$0xff]   ;;  %v2280_v20 = vld [vmem:[#allocation5 + $0x50] sm:$0xff]  }
  0x2f   :  { %v2274_v14 = vld [vmem:[#allocation5 + $0x20] sm:$0xff]   ;;  %v2278_v18 = vld [vmem:[#allocation5 + $0x18] sm:$0xff]   ;;  %v2281_v21 = vld [vmem:[#allocation5 + $0xd0] sm:$0xff]  }
  0x30   :  { %2030 = vmatpush3.bf16.msra.mxu0 %v2266_v6  ;;  %v2275_v15 = vld [vmem:[#allocation5 + $0xa0] sm:$0xff]   ;;  %v2279_v19 = vld [vmem:[#allocation5 + $0x98] sm:$0xff]   ;;  %v2282_v22 = vld [vmem:[#allocation5 + $0x10] sm:$0xff]  }
  0x31   :  { %2052 = vmatpush3.bf16.msra.mxu1 %v2267_v7  ;;  %2031 = vmatprep.subr.bf16.mxu0 %v2268_v8  ;;  %v2283_v23 = vld [vmem:[#allocation5 + $0x90] sm:$0xff]   ;;  %v2284_v24 = vld [vmem:[#allocation5 + $0x48] sm:$0xff]   ;;  %v2288_v28 = vld [vmem:[#allocation5 + $0x40] sm:$0xff]  }
  0x32   :  { %2053 = vmatprep.subr.bf16.mxu1 %v2269_v9  ;;  %v2285_v25 = vld [vmem:[#allocation5 + $0xc8] sm:$0xff]   ;;  %v2289_v29 = vld [vmem:[#allocation5 + $0xc0] sm:$0xff]   ;;  %v2292_v40 = vld [vmem:[#allocation5 + $0x178] sm:$0xff]  }
  0x33   :  { %v2286_v26 = vld [vmem:[#allocation5 + $0x8] sm:$0xff]   ;;  %v2290_v30 = vld [vmem:[#allocation5] sm:$0xff]   ;;  %v2293_v41 = vld [vmem:[#allocation5 + $0x1f8] sm:$0xff]  }
  0x34   :  { %2032 = vmatpush3.bf16.msra.mxu0 %v2270_v10  ;;  %v2287_v27 = vld [vmem:[#allocation5 + $0x88] sm:$0xff]   ;;  %v2291_v31 = vld [vmem:[#allocation5 + $0x80] sm:$0xff]   ;;  %v2294_v42 = vld [vmem:[#allocation5 + $0x138] sm:$0xff]  }
  0x35   :  { %2054 = vmatpush3.bf16.msra.mxu1 %v2271_v11  ;;  %2033 = vmatprep.subr.bf16.mxu0 %v2272_v12  ;;  %v69_v32 = vld [vmem:[#allocation2] sm:$0xff]  ;;  %v70_v34 = vld [vmem:[#allocation2 + $0x8] sm:$0xff]  ;;  %v2295_v43 = vld [vmem:[#allocation5 + $0x1b8] sm:$0xff]  }
  0x36   :  { %2055 = vmatprep.subr.bf16.mxu1 %v2273_v13  ;;  %v73_v33 = vld [vmem:[#allocation2 + $0x20] sm:$0xff]  ;;  %v74_v37 = vld [vmem:[#allocation2 + $0x28] sm:$0xff]  ;;  %v2296_v44 = vld [vmem:[#allocation5 + $0x170] sm:$0xff]  }
  0x37   :  { %v1842_v35 = vcombine.low %v69_v32, %v73_v33  ;;  %v1843_v36 = vcombine.high %v69_v32, %v73_v33  ;;  %v1844_v38 = vcombine.low %v70_v34, %v74_v37  ;;  %v1845_v39 = vcombine.high %v70_v34, %v74_v37  ;;  %v2297_v45 = vld [vmem:[#allocation5 + $0x1f0] sm:$0xff]   ;;  %v2300_v48 = vld [vmem:[#allocation5 + $0x168] sm:$0xff]   ;;  %v2304_v52 = vld [vmem:[#allocation5 + $0x160] sm:$0xff]  }
  0x38   :  { %2034 = vmatpush3.bf16.msra.mxu0 %v2274_v14  ;;  %v2298_v46 = vld [vmem:[#allocation5 + $0x130] sm:$0xff]   ;;  %v2301_v49 = vld [vmem:[#allocation5 + $0x1e8] sm:$0xff]   ;;  %v2305_v53 = vld [vmem:[#allocation5 + $0x1e0] sm:$0xff]  }
  0x39   :  { %2056 = vmatpush3.bf16.msra.mxu1 %v2275_v15  ;;  %2035 = vmatprep.subr.bf16.mxu0 %v2276_v16  ;;  %v2299_v47 = vld [vmem:[#allocation5 + $0x1b0] sm:$0xff]   ;;  %v2302_v50 = vld [vmem:[#allocation5 + $0x128] sm:$0xff]   ;;  %v2306_v54 = vld [vmem:[#allocation5 + $0x120] sm:$0xff]  }
  0x3a   :  { %2057 = vmatprep.subr.bf16.mxu1 %v2277_v17  ;;  %670 = vmatprep.mubr.bf16.mxu0 %v1843_v36  ;;  %v2303_v51 = vld [vmem:[#allocation5 + $0x1a8] sm:$0xff]   ;;  %v2307_v55 = vld [vmem:[#allocation5 + $0x1a0] sm:$0xff]   ;;  %v2308_v56 = vld [vmem:[#allocation5 + $0x158] sm:$0xff]   ;;  %v2519_v17 = vmov 0.0  }
  0x3b   :  { %711 = vmatprep.mubr.bf16.mxu1 %v1845_v39  ;;  %v2309_v57 = vld [vmem:[#allocation5 + $0x1d8] sm:$0xff]   ;;  %v2312_v60 = vld [vmem:[#allocation5 + $0x150] sm:$0xff]   ;;  %v2316_v0 = vld [vmem:[#allocation5 + $0x148] sm:$0xff]  }
  0x3c   :  { %2036 = vmatpush3.bf16.msra.mxu0 %v2278_v18  ;;  %v2310_v58 = vld [vmem:[#allocation5 + $0x118] sm:$0xff]   ;;  %v2313_v61 = vld [vmem:[#allocation5 + $0x1d0] sm:$0xff]   ;;  %v2317_v1 = vld [vmem:[#allocation5 + $0x1c8] sm:$0xff]  }
  0x3d   :  { %2058 = vmatpush3.bf16.msra.mxu1 %v2279_v19  ;;  %2037 = vmatprep.subr.bf16.mxu0 %v2280_v20  ;;  %v2311_v59 = vld [vmem:[#allocation5 + $0x198] sm:$0xff]   ;;  %v2314_v62 = vld [vmem:[#allocation5 + $0x110] sm:$0xff]   ;;  %v2318_v2 = vld [vmem:[#allocation5 + $0x108] sm:$0xff]  }
  0x3e   :  { %2059 = vmatprep.subr.bf16.mxu1 %v2281_v21  ;;  %v2315_v63 = vld [vmem:[#allocation5 + $0x190] sm:$0xff]   ;;  %v2319_v3 = vld [vmem:[#allocation5 + $0x188] sm:$0xff]   ;;  %v2320_v4 = vld [vmem:[#allocation5 + $0x140] sm:$0xff]  }
  0x3f   :  { %v2321_v5 = vld [vmem:[#allocation5 + $0x1c0] sm:$0xff]   ;;  %v71_v8 = vld [vmem:[#allocation2 + $0x10] sm:$0xff]  ;;  %v72_v12 = vld [vmem:[#allocation2 + $0x18] sm:$0xff] }
  0x40   :  { %2038 = vmatpush3.bf16.msra.mxu0 %v2282_v22  ;;  %v2322_v6 = vld [vmem:[#allocation5 + $0x100] sm:$0xff]   ;;  %v75_v9 = vld [vmem:[#allocation2 + $0x30] sm:$0xff]  ;;  %v76_v13 = vld [vmem:[#allocation2 + $0x38] sm:$0xff] }
  0x41   :  { %2060 = vmatpush3.bf16.msra.mxu1 %v2283_v23  ;;  %2039 = vmatprep.subr.bf16.mxu0 %v2284_v24  ;;  %v2323_v7 = vld [vmem:[#allocation5 + $0x180] sm:$0xff]   ;;  %v1846_v10 = vcombine.low %v71_v8, %v75_v9  ;;  %v1847_v11 = vcombine.high %v71_v8, %v75_v9  ;;  %v1848_v14 = vcombine.low %v72_v12, %v76_v13  ;;  %v2324_v16 = vld [vmem:[#allocation7 + $0x38] sm:$0xff]   ;;  %v2325_v18 = vld [vmem:[#allocation7 + $0x30] sm:$0xff]  }
  0x42   :  { %2061 = vmatprep.subr.bf16.mxu1 %v2285_v25  ;;  %v1849_v15 = vcombine.high %v72_v12, %v76_v13  ;;  %v2326_v19 = vld [vmem:[#allocation7 + $0x28] sm:$0xff]   ;;  %v2327_v20 = vld [vmem:[#allocation7 + $0x20] sm:$0xff]   ;;  %v2328_v21 = vld [vmem:[#allocation7 + $0x18] sm:$0xff]  }
  0x43   :  { %v2329_v22 = vld [vmem:[#allocation7 + $0x10] sm:$0xff]   ;;  %v2330_v23 = vld [vmem:[#allocation7 + $0x8] sm:$0xff]   ;;  %v2331_v24 = vld [vmem:[#allocation7] sm:$0xff]  }
  0x44   :  { %2040 = vmatpush3.bf16.msra.mxu0 %v2286_v26  ;;  %v77_v25 = vld [vmem:[%s2675_s1] sm:$0xff]  ;;  %v2521_v26 = vmov 0  }
  0x45   :  { %2062 = vmatpush3.bf16.msra.mxu1 %v2287_v27  ;;  %2041 = vmatprep.subr.bf16.mxu0 %v2288_v28  ;;  %v78_v27 = vld [vmem:[%s2675_s1 + $0x8] sm:$0xff] }
  0x46   :  { %2063 = vmatprep.subr.bf16.mxu1 %v2289_v29  ;;  %2259 = vset.pattern.permute.xlu0 %v2521_v26 }
  0x47   :  { %922 = vperm.xlu0 %2259, %v77_v25  }
  0x48   :  { %2042 = vmatpush3.bf16.msra.mxu0 %v2290_v30 }
  0x49   :  { %2064 = vmatpush3.bf16.msra.mxu1 %v2291_v31  ;;  %2071 = vmatprep.subr.bf16.mxu0 %v2292_v40 }
  0x4a   :  { %2093 = vmatprep.subr.bf16.mxu1 %v2293_v41 }
  0x4b   :  { %671 = vmatmul.mubr.bf16.vlgmr.msra.gmra.mxu0 %v1842_v35  ;;  %925 = vperm.xlu0 %2259, %v78_v27   ;;  %v1841_v35 = vld [vmem:[%s2677_s3] ss:$0 sm:$0xff] }
  0x4c   :  { %712 = vmatmul.mubr.bf16.vlgmr.msra.gmra.mxu1 %v1844_v38  ;;  %2072 = vmatpush3.bf16.msra.mxu0 %v2294_v42  ;;  %v2339_v27 = vld [vmem:[#allocation7] sm:$0xff]  }
  0x4d   :  { %2094 = vmatpush3.bf16.msra.mxu1 %v2295_v43  ;;  %2073 = vmatprep.subr.bf16.mxu0 %v2296_v44 }
  0x4e   :  { %2095 = vmatprep.subr.bf16.mxu1 %v2297_v45  ;;  %752 = vmatprep.mubr.bf16.mxu0 %v1847_v11 }
  0x4f   :  { %793 = vmatprep.mubr.bf16.mxu1 %v1849_v15  ;;  %v2333_v15 = vld [vmem:[#allocation7 + $0x30] sm:$0xff]  }
  0x50   :  { %2074 = vmatpush3.bf16.msra.mxu0 %v2298_v46 }
  0x51   :  { %2096 = vmatpush3.bf16.msra.mxu1 %v2299_v47  ;;  %2075 = vmatprep.subr.bf16.mxu0 %v2300_v48 }
  0x52   :  { %2097 = vmatprep.subr.bf16.mxu1 %v2301_v49 }
  0x54   :  { %2076 = vmatpush3.bf16.msra.mxu0 %v2302_v50 }
  0x55   :  { %2098 = vmatpush3.bf16.msra.mxu1 %v2303_v51  ;;  %2077 = vmatprep.subr.bf16.mxu0 %v2304_v52 }
  0x56   :  { %2099 = vmatprep.subr.bf16.mxu1 %v2305_v53 }
  0x58   :  { %2078 = vmatpush3.bf16.msra.mxu0 %v2306_v54 }
  0x59   :  { %2100 = vmatpush3.bf16.msra.mxu1 %v2307_v55  ;;  %2079 = vmatprep.subr.bf16.mxu0 %v2308_v56 }
  0x5a   :  { %2101 = vmatprep.subr.bf16.mxu1 %v2309_v57 }
  0x5c   :  { %2080 = vmatpush3.bf16.msra.mxu0 %v2310_v58 }
  0x5d   :  { %2102 = vmatpush3.bf16.msra.mxu1 %v2311_v59  ;;  %2081 = vmatprep.subr.bf16.mxu0 %v2312_v60 }
  0x5e   :  { %2103 = vmatprep.subr.bf16.mxu1 %v2313_v61 }
  0x60   :  { %2082 = vmatpush3.bf16.msra.mxu0 %v2314_v62 }
  0x61   :  { %2104 = vmatpush3.bf16.msra.mxu1 %v2315_v63  ;;  %2083 = vmatprep.subr.bf16.mxu0 %v2316_v0 }
  0x62   :  { %2105 = vmatprep.subr.bf16.mxu1 %v2317_v1  ;;  %v919_v1 = vlaneseq }
  0x64   :  { %2084 = vmatpush3.bf16.msra.mxu0 %v2318_v2  ;;  %v2602_v2 = vand.u32 127, %v919_v1  ;;  %v2367_v1 = vld [vmem:[#allocation5 + $0x88] sm:$0xff]  }
  0x65   :  { %2106 = vmatpush3.bf16.msra.mxu1 %v2319_v3  ;;  %2085 = vmatprep.subr.bf16.mxu0 %v2320_v4  ;;  %v1914_v4 = vld [vmem:[%s2679_s5] ss:$0 sm:$0xff]  ;;  %s2522_s5 = smov [#allocation8]  }
  0x66   :  { %2107 = vmatprep.subr.bf16.mxu1 %v2321_v5  ;;  %s1812_s23 = sshll.u32 %s2522_s5, 4  ;;  %s1813_s23 = int_to_ptr.vmem [resolvable:$true] %s1812_s23 }
  0x67   :  { %s2464_s24 = scalar_lea.vmem %s1813_s23, 256  ;;  %p2469_p2 = scmp.lt.s32.totalorder %s1813_s23, %s1813_s23 }
  0x68   :  { %2086 = vmatpush3.bf16.msra.mxu0 %v2322_v6  ;;  %p2465_p1 = scmp.ne.s32.totalorder %s1813_s23, %s2464_s24  ;;  %p2470_p3 = scmp.lt.s32.totalorder %s2464_s24, %s2464_s24 }
  0x69   :  { %2108 = vmatpush3.bf16.msra.mxu1 %v2323_v7  ;;  %2205 = vmatprep.subr.bf16.mxu0 %v2519_v17 }
  0x6a   :  { %2225 = vmatprep.subr.bf16.mxu1 %v2519_v17  ;;  %p2471_p4 = por %p2470_p3, %p2469_p2 }
  0x6b   :  { %753 = vmatmul.mubr.bf16.vlgmr.msra.gmra.mxu0 %v1846_v10 }
  0x6c   :  { %794 = vmatmul.mubr.bf16.vlgmr.msra.gmra.mxu1 %v1848_v14  ;;  %2206 = vmatpush3.bf16.msra.mxu0 %v2324_v16  ;;  %v2332_v14 = vld [vmem:[#allocation7 + $0x38] sm:$0xff]   ;;  %v2334_v16 = vld [vmem:[#allocation7 + $0x28] sm:$0xff]   ;;  %p2472_p5 = pnand %p2471_p4, %p2465_p1 }
  0x6d   :  { %2207 = vmatprep.subr.bf16.mxu0 %v2519_v17  ;;  %2221 = vmatprep.mubr.msk.bf16.mxu0 %vm2520_vm0, %v2519_v17 }
  0x6e   :  { %2241 = vmatprep.mubr.msk.bf16.mxu1 %vm2520_vm0, %v2519_v17  ;;  %2226 = vmatpush3.bf16.xpose.msra.mxu1 %v2332_v14  ;;  %v2376_v14 = vld [vmem:[#allocation5 + $0x170] sm:$0xff]  }
  0x6f   :  { %2227 = vmatprep.subr.bf16.mxu1 %v2519_v17 }
  0x70   :  { %2208 = vmatpush3.bf16.msra.mxu0 %v2325_v18  ;;  %v2335_v18 = vld [vmem:[#allocation7 + $0x20] sm:$0xff]  }
  0x71   :  { %2209 = vmatprep.subr.bf16.mxu0 %v2519_v17 }
  0x74   :  { %2210 = vmatpush3.bf16.msra.mxu0 %v2326_v19  ;;  %v2336_v19 = vld [vmem:[#allocation7 + $0x18] sm:$0xff]  }
  0x75   :  { %2211 = vmatprep.subr.bf16.mxu0 %v2519_v17 }
  0x76   :  { %2228 = vmatpush3.bf16.xpose.msra.mxu1 %v2333_v15  ;;  %v2377_v15 = vld [vmem:[#allocation5 + $0x1f0] sm:$0xff]  }
  0x77   :  { %2229 = vmatprep.subr.bf16.mxu1 %v2519_v17 }
  0x78   :  { %2212 = vmatpush3.bf16.msra.mxu0 %v2327_v20  ;;  %v2337_v20 = vld [vmem:[#allocation7 + $0x10] sm:$0xff]  }
  0x79   :  { %2213 = vmatprep.subr.bf16.mxu0 %v2519_v17 }
  0x7c   :  { %2214 = vmatpush3.bf16.msra.mxu0 %v2328_v21  ;;  %v2338_v21 = vld [vmem:[#allocation7 + $0x8] sm:$0xff]  }
  0x7d   :  { %2215 = vmatprep.subr.bf16.mxu0 %v2519_v17 }
  0x7e   :  { %2230 = vmatpush3.bf16.xpose.msra.mxu1 %v2334_v16  ;;  %v2378_v16 = vld [vmem:[#allocation5 + $0x130] sm:$0xff]  }
  0x7f   :  { %2231 = vmatprep.subr.bf16.mxu1 %v2519_v17 }
  0x80   :  { %2216 = vmatpush3.bf16.msra.mxu0 %v2329_v22  ;;  %v941_v22 = vcvt.s32.f32 %v2602_v2 }
  0x81   :  { %2217 = vmatprep.subr.bf16.mxu0 %v2519_v17 }
  0x84   :  { %2218 = vmatpush3.bf16.msra.mxu0 %v2330_v23 }
  0x85   :  { %2219 = vmatprep.subr.bf16.mxu0 %v2519_v17 }
  0x86   :  { %2232 = vmatpush3.bf16.xpose.msra.mxu1 %v2335_v18  ;;  %v2379_v18 = vld [vmem:[#allocation5 + $0x1b0] sm:$0xff]  }
  0x87   :  { %2233 = vmatprep.subr.bf16.mxu1 %v2519_v17 }
  0x88   :  { %2220 = vmatpush3.bf16.msra.mxu0 %v2331_v24 }
  0x8e   :  { %2234 = vmatpush3.bf16.xpose.msra.mxu1 %v2336_v19  ;;  %v2380_v19 = vld [vmem:[#allocation5 + $0x168] sm:$0xff]  }
  0x8f   :  { %2235 = vmatprep.subr.bf16.mxu1 %v2519_v17 }
  0x96   :  { %2236 = vmatpush3.bf16.xpose.msra.mxu1 %v2337_v20  ;;  %v2381_v20 = vld [vmem:[#allocation5 + $0x1e8] sm:$0xff]  }
  0x97   :  { %2237 = vmatprep.subr.bf16.mxu1 %v2519_v17 }
  0x9e   :  { %2238 = vmatpush3.bf16.xpose.msra.mxu1 %v2338_v21  ;;  %v2382_v21 = vld [vmem:[#allocation5 + $0x128] sm:$0xff]  }
  0x9f   :  { %2239 = vmatprep.subr.bf16.mxu1 %v2519_v17 }
  0xa6   :  { %2240 = vmatpush3.bf16.xpose.msra.mxu1 %v2339_v27  ;;  %v2388_v27 = vld [vmem:[#allocation5 + $0x158] sm:$0xff]  }
  0xc2   :  { %v2604_v3 = vpop.permute.xlu0 %922 }
  0xc3   :  { %vm927_vm4 = vcmp.eq.s32.totalorder %v2602_v2, %v2604_v3  ;;  %v2370_v3 = vld [vmem:[#allocation5] sm:$0xff]  }
  0xc6   :  { %v2611_v8 = vpop.permute.xlu0 %925 }
  0xc7   :  { %vm928_vm5 = vcmp.eq.s32.totalorder %v2602_v2, %v2611_v8  ;;  %v2369_v2 = vld [vmem:[#allocation5 + $0xc0] sm:$0xff]  }
 0x10b   :  { %v2043_v28 = vpop.f32.mrf.mxu0 }
 0x10c   :  { %v2065_v29 = vpop.f32.mrf.mxu1 }
 0x10d   :  { %v2044_v30 = vpop.f32.mrf.mxu0 }
 0x10e   :  { %v2066_v31 = vpop.f32.mrf.mxu1  ;;  %v2045_v33 = vadd.f32 %v2044_v30, %v2043_v28  ;;  %v2340_v28 = vld [vmem:[#allocation5 + $0x78] sm:$0xff]  }
 0x10f   :  { %v2046_v32 = vpop.f32.mrf.mxu0  ;;  %v2067_v38 = vadd.f32 %v2066_v31, %v2065_v29  ;;  %v2341_v29 = vld [vmem:[#allocation5 + $0xf8] sm:$0xff]   ;;  %v2344_v31 = vld [vmem:[#allocation5 + $0x70] sm:$0xff]   ;;  %2133 = vmatprep.subr.bf16.mxu0 %v2340_v28 }
 0x110   :  { %v2068_v34 = vpop.f32.mrf.mxu1  ;;  %v673_v37 = vadd.f32 %v2045_v33, %v1841_v35  ;;  %v2342_v30 = vld [vmem:[#allocation5 + $0x38] sm:$0xff]   ;;  %2151 = vmatprep.subr.bf16.mxu1 %v2341_v29  ;;  %v2348_v33 = vld [vmem:[#allocation5 + $0x68] sm:$0xff]  }
 0x111   :  { %v2047_v36 = vpop.f32.mrf.mxu0  ;;  %v2389_v28 = vld [vmem:[#allocation5 + $0x1d8] sm:$0xff]  }
 0x112   :  { %v2048_v39 = vadd.f32 %v2047_v36, %v2046_v32  ;;  %v2069_v40 = vpop.f32.mrf.mxu1  ;;  %v714_v44 = vadd.f32 %v2067_v38, %v673_v37  ;;  %v2346_v32 = vld [vmem:[#allocation5 + $0x30] sm:$0xff]   ;;  %v2354_v36 = vld [vmem:[#allocation5 + $0x20] sm:$0xff]   ;;  %v2356_v37 = vld [vmem:[#allocation5 + $0x58] sm:$0xff]  }
 0x113   :  { %v2070_v49 = vadd.f32 %v2069_v40, %v2068_v34  ;;  %v2350_v34 = vld [vmem:[#allocation5 + $0x28] sm:$0xff]   ;;  %v2358_v38 = vld [vmem:[#allocation5 + $0x18] sm:$0xff]   ;;  %v2362_v40 = vld [vmem:[#allocation5 + $0x10] sm:$0xff]  }
 0x114   :  { %v676_v45 = vadd.f32 %v2048_v39, %v1841_v35  ;;  %v2352_v35 = vld [vmem:[#allocation5 + $0x60] sm:$0xff]   ;;  %v2360_v39 = vld [vmem:[#allocation5 + $0x50] sm:$0xff]   ;;  %v2390_v29 = vld [vmem:[#allocation5 + $0x118] sm:$0xff]  }
 0x116   :  { %v717_v53 = vadd.f32 %v2070_v49, %v676_v45 }
 0x12b   :  { %v2087_v41 = vpop.f32.mrf.mxu0 }
 0x12c   :  { %v2109_v42 = vpop.f32.mrf.mxu1 }
 0x12d   :  { %v2088_v43 = vpop.f32.mrf.mxu0 }
 0x12e   :  { %v2089_v46 = vadd.f32 %v2088_v43, %v2087_v41  ;;  %v2110_v47 = vpop.f32.mrf.mxu1  ;;  %v2364_v41 = vld [vmem:[#allocation5 + $0x48] sm:$0xff]   ;;  %v2368_v43 = vld [vmem:[#allocation5 + $0x40] sm:$0xff]  }
 0x12f   :  { %v2090_v48 = vpop.f32.mrf.mxu0  ;;  %v2111_v54 = vadd.f32 %v2110_v47, %v2109_v42  ;;  %v2366_v42 = vld [vmem:[#allocation5 + $0x8] sm:$0xff]   ;;  %v1923_v47 = vsel %vm927_vm4, 1.0, %v2519_v17 }
 0x130   :  { %v755_v50 = vadd.f32 %v2089_v46, %v714_v44  ;;  %v2112_v51 = vpop.f32.mrf.mxu1 }
 0x131   :  { %v2091_v52 = vpop.f32.mrf.mxu0 }
 0x132   :  { %v2092_v55 = vadd.f32 %v2091_v52, %v2090_v48  ;;  %v2113_v56 = vpop.f32.mrf.mxu1  ;;  %v796_v57 = vadd.f32 %v2111_v54, %v755_v50  ;;  %v1924_v48 = vsel %vm928_vm5, 1.0, %v2519_v17  ;;  %v2343_v52 = vld [vmem:[#allocation5 + $0xb8] sm:$0xff]   ;;  %v2345_v54 = vld [vmem:[#allocation5 + $0xf0] sm:$0xff]  }
 0x133   :  { %v2114_v59 = vadd.f32 %v2113_v56, %v2112_v51  ;;  %v2349_v56 = vld [vmem:[#allocation5 + $0xe8] sm:$0xff]  }
 0x134   :  { %v758_v58 = vadd.f32 %v2092_v55, %v717_v53  ;;  %v802_v61 = vmax.f32 %v796_v57, 0.0  ;;  %vm1062_vm1 = vcmp.gt.f32.partialorder %v796_v57, 0.0  ;;  %v2347_v55 = vld [vmem:[#allocation5 + $0xb0] sm:$0xff]   ;;  %v2351_v57 = vld [vmem:[#allocation5 + $0xa8] sm:$0xff]  }
 0x136   :  { %v799_v60 = vadd.f32 %v2114_v59, %v758_v58  ;;  %v2353_v58 = vld [vmem:[#allocation5 + $0xe0] sm:$0xff]  }
 0x137   :  { %v2355_v59 = vld [vmem:[#allocation5 + $0xa0] sm:$0xff]  }
 0x138   :  { %v803_v62 = vmax.f32 %v799_v60, 0.0  ;;  %vm1063_vm2 = vcmp.gt.f32.partialorder %v799_v60, 0.0  ;;  %v2357_v60 = vld [vmem:[#allocation5 + $0xd8] sm:$0xff]  }
 0x139   :  { %vm2598_vm3 = vmpackc.low %vm1063_vm2, %vm1062_vm1 }
 0x13a   :  { %v804_v0 = vpack.c.bf16 %v803_v62, %v802_v61  ;;  %v2361_v61 = vld [vmem:[#allocation5 + $0xd0] sm:$0xff]  }
 0x13b   :  { %v2363_v62 = vld [vmem:[#allocation5 + $0x90] sm:$0xff]  }
 0x13c   :  { %2222 = vmatmul.mubr.bf16.vlgmr.msra.gmra.mxu0 %v804_v0  ;;  %v2365_v0 = vld [vmem:[#allocation5 + $0xc8] sm:$0xff]  }
 0x13d   :  { %2134 = vmatpush3.bf16.xpose.msra.mxu0 %v2342_v30  ;;  %v2391_v30 = vld [vmem:[#allocation5 + $0x198] sm:$0xff]  }
 0x13e   :  { %2135 = vmatprep.subr.bf16.mxu0 %v2344_v31  ;;  %v2392_v31 = vld [vmem:[#allocation5 + $0x150] sm:$0xff]  }
 0x145   :  { %2136 = vmatpush3.bf16.xpose.msra.mxu0 %v2346_v32  ;;  %v2393_v32 = vld [vmem:[#allocation5 + $0x1d0] sm:$0xff]  }
 0x146   :  { %2137 = vmatprep.subr.bf16.mxu0 %v2348_v33  ;;  %v2394_v33 = vld [vmem:[#allocation5 + $0x110] sm:$0xff]  }
 0x14d   :  { %2138 = vmatpush3.bf16.xpose.msra.mxu0 %v2350_v34  ;;  %v2395_v34 = vld [vmem:[#allocation5 + $0x190] sm:$0xff]  }
 0x14e   :  { %2139 = vmatprep.subr.bf16.mxu0 %v2352_v35  ;;  %v2396_v35 = vld [vmem:[#allocation5 + $0x148] sm:$0xff]  }
 0x155   :  { %2140 = vmatpush3.bf16.xpose.msra.mxu0 %v2354_v36  ;;  %v2397_v36 = vld [vmem:[#allocation5 + $0x1c8] sm:$0xff]  }
 0x156   :  { %2141 = vmatprep.subr.bf16.mxu0 %v2356_v37  ;;  %v2398_v37 = vld [vmem:[#allocation5 + $0x108] sm:$0xff]  }
 0x15d   :  { %2142 = vmatpush3.bf16.xpose.msra.mxu0 %v2358_v38  ;;  %v2399_v38 = vld [vmem:[#allocation5 + $0x188] sm:$0xff]  }
 0x15e   :  { %2143 = vmatprep.subr.bf16.mxu0 %v2360_v39  ;;  %v2400_v39 = vld [vmem:[#allocation5 + $0x140] sm:$0xff]  }
 0x165   :  { %2144 = vmatpush3.bf16.xpose.msra.mxu0 %v2362_v40  ;;  %v2401_v40 = vld [vmem:[#allocation5 + $0x1c0] sm:$0xff]  }
 0x166   :  { %2145 = vmatprep.subr.bf16.mxu0 %v2364_v41  ;;  %v2402_v41 = vld [vmem:[#allocation5 + $0x100] sm:$0xff]  }
 0x16d   :  { %2146 = vmatpush3.bf16.xpose.msra.mxu0 %v2366_v42  ;;  %v2403_v42 = vld [vmem:[#allocation5 + $0x180] sm:$0xff]  }
 0x16e   :  { %2147 = vmatprep.subr.bf16.mxu0 %v2368_v43 }
 0x175   :  { %2148 = vmatpush3.bf16.xpose.msra.mxu0 %v2370_v3 }
 0x1fc   :  { %v910_v5 = vpop.f32.mrf.mxu0 }
 0x1fd   :  { %v911_v6 = vadd.f32 %v1914_v4, %v910_v5  ;;  %v2372_v5 = vld [vmem:[#allocation5 + $0x178] sm:$0xff]  }
 0x1fe   :  { %v2223_v7 = vpop.f32.mrf.mxu0  ;;  %2169 = vmatprep.subr.bf16.mxu0 %v2372_v5 }
 0x1ff   :  { %917 = vst [vmem:[#allocation8] sm:$0xff] %v911_v6  ;;  %v933_v9 = vsel %vm927_vm4, -1e+30, %v911_v6  ;;  %v2373_v6 = vld [vmem:[#allocation5 + $0x1f8] sm:$0xff]  }
 0x200   :  { %935 = vmax.xlane.f32.xlu1 %v933_v9  ;;  %v913_v10 = vpop.f32.mrf.mxu0 }
 0x201   :  { %v914_v11 = vadd.f32 %v1914_v4, %v913_v10  ;;  %v2371_v4 = vld [vmem:[#allocation5 + $0x80] sm:$0xff]  }
 0x202   :  { %v2224_v12 = vpop.f32.mrf.mxu0 }
 0x203   :  { %918 = vst [vmem:[#allocation8 + $0x8] sm:$0xff] %v914_v11  ;;  %v934_v13 = vsel %vm928_vm5, -1e+30, %v914_v11  ;;  %v2374_v11 = vld [vmem:[#allocation5 + $0x138] sm:$0xff]  }
 0x204   :  { %937 = vmax.xlane.f32.xlu1 %v934_v13  ;;  %v2375_v12 = vld [vmem:[#allocation5 + $0x1b8] sm:$0xff]  }
 0x289   :  { %v936_v23 = vpop.xlane.xlu1 %935 }
 0x28a   :  { %vm939_vm6 = vcmp.ge.f32.partialorder %v933_v9, %v936_v23  ;;  %v2384_v23 = vld [vmem:[#allocation5 + $0x160] sm:$0xff]  }
 0x28b   :  { %v942_v24 = vsel %vm939_vm6, %v941_v22, 128.0 }
 0x28c   :  { %944 = vmin.xlane.f32.xlu0 %v942_v24  ;;  %v2385_v24 = vld [vmem:[#allocation5 + $0x1e0] sm:$0xff]  }
 0x28d   :  { %v938_v25 = vpop.xlane.xlu1 %937 }
 0x28e   :  { %vm940_vm7 = vcmp.ge.f32.partialorder %v934_v13, %v938_v25  ;;  %v2386_v25 = vld [vmem:[#allocation5 + $0x120] sm:$0xff]  }
 0x28f   :  { %v943_v26 = vsel %vm940_vm7, %v941_v22, 128.0 }
 0x290   :  { %946 = vmin.xlane.f32.xlu1 %v943_v26  ;;  %v2387_v26 = vld [vmem:[#allocation5 + $0x1a0] sm:$0xff]  }
 0x315   :  { %v945_v44 = vpop.xlane.xlu0 %944 }
 0x316   :  { %vm948_vm8 = vcmp.eq.f32.partialorder %v941_v22, %v945_v44 }
 0x317   :  { %v1925_v45 = vsel %vm948_vm8, 1.0, %v2519_v17 }
 0x318   :  { %v954_v50 = vsub.f32 %v1925_v45, %v1923_v47 }
 0x319   :  { %v947_v46 = vpop.xlane.xlu1 %946 }
 0x31a   :  { %vm949_vm9 = vcmp.eq.f32.partialorder %v941_v22, %v947_v46  ;;  %v2383_v22 = vld [vmem:[#allocation5 + $0x1a8] sm:$0xff]  }
 0x31b   :  { %v1926_v49 = vsel %vm949_vm9, 1.0, %v2519_v17  ;;  %v2359_v17 = vld [vmem:[#allocation5 + $0x98] sm:$0xff]  }
 0x31c   :  { %v955_v51 = vsub.f32 %v1926_v49, %v1924_v48 }
 0x31e   :  { %v956_v53 = vpack.c.bf16 %v955_v51, %v954_v50 }
 0x320   :  { %2242 = vmatmul.mubr.bf16.vlgmr.msra.gmra.mxu1 %v956_v53 }
 0x321   :  { %2152 = vmatpush3.bf16.xpose.msra.mxu1 %v2343_v52 }
 0x322   :  { %2153 = vmatprep.subr.bf16.mxu1 %v2345_v54 }
 0x329   :  { %2154 = vmatpush3.bf16.xpose.msra.mxu1 %v2347_v55 }
 0x32a   :  { %2155 = vmatprep.subr.bf16.mxu1 %v2349_v56 }
 0x331   :  { %2156 = vmatpush3.bf16.xpose.msra.mxu1 %v2351_v57 }
 0x332   :  { %2157 = vmatprep.subr.bf16.mxu1 %v2353_v58 }
 0x339   :  { %2158 = vmatpush3.bf16.xpose.msra.mxu1 %v2355_v59 }
 0x33a   :  { %2159 = vmatprep.subr.bf16.mxu1 %v2357_v60 }
 0x341   :  { %2160 = vmatpush3.bf16.xpose.msra.mxu1 %v2359_v17 }
 0x342   :  { %2161 = vmatprep.subr.bf16.mxu1 %v2361_v61 }
 0x349   :  { %2162 = vmatpush3.bf16.xpose.msra.mxu1 %v2363_v62 }
 0x34a   :  { %2163 = vmatprep.subr.bf16.mxu1 %v2365_v0 }
 0x351   :  { %2164 = vmatpush3.bf16.xpose.msra.mxu1 %v2367_v1 }
 0x352   :  { %2165 = vmatprep.subr.bf16.mxu1 %v2369_v2 }
 0x359   :  { %2166 = vmatpush3.bf16.xpose.msra.mxu1 %v2371_v4 }
 0x35a   :  { %2187 = vmatprep.subr.bf16.mxu1 %v2373_v6 }
 0x3e0   :  { %v1055_v7 = vpop.f32.mrf.mxu1 }
 0x3e2   :  { %v2243_v8 = vpop.f32.mrf.mxu1 }
 0x3e4   :  { %v1058_v9 = vpop.f32.mrf.mxu1 }
 0x3e5   :  { %v2639_v10 = vpack.c.bf16 %v1058_v9, %v1055_v7 }
 0x3e6   :  { %v2244_v13 = vpop.f32.mrf.mxu1 }
 0x3e7   :  { %2149 = vmatprep.mubr.msk.bf16.mxu0 %vm2598_vm3, %v2639_v10  ;;  %2167 = vmatprep.mubr.msk.bf16.mxu1 %vm2598_vm3, %v2639_v10 }
 0x3e8   :  { %2150 = vmatmul.mubr.msk.bf16.vlgmr.msra.gmra.mxu0 %vm2598_vm3, %v2639_v10  ;;  %2168 = vmatmul.mubr.msk.bf16.vlgmr.msra.gmra.mxu1 %vm2598_vm3, %v2639_v10 }
 0x3e9   :  { %2170 = vmatpush3.bf16.xpose.msra.mxu0 %v2374_v11  ;;  %2188 = vmatpush3.bf16.xpose.msra.mxu1 %v2375_v12 }
 0x3ea   :  { %2185 = vmatprep.mubr.msk.bf16.mxu0 %vm2598_vm3, %v2639_v10  ;;  %2203 = vmatprep.mubr.msk.bf16.mxu1 %vm2598_vm3, %v2639_v10 }
 0x3eb   :  { %2171 = vmatprep.subr.bf16.mxu0 %v2376_v14  ;;  %2189 = vmatprep.subr.bf16.mxu1 %v2377_v15 }
 0x3f1   :  { %2172 = vmatpush3.bf16.xpose.msra.mxu0 %v2378_v16  ;;  %2190 = vmatpush3.bf16.xpose.msra.mxu1 %v2379_v18 }
 0x3f2   :  { %2173 = vmatprep.subr.bf16.mxu0 %v2380_v19  ;;  %2191 = vmatprep.subr.bf16.mxu1 %v2381_v20 }
 0x3f9   :  { %2174 = vmatpush3.bf16.xpose.msra.mxu0 %v2382_v21  ;;  %2192 = vmatpush3.bf16.xpose.msra.mxu1 %v2383_v22 }
 0x3fa   :  { %2175 = vmatprep.subr.bf16.mxu0 %v2384_v23  ;;  %2193 = vmatprep.subr.bf16.mxu1 %v2385_v24 }
 0x401   :  { %2176 = vmatpush3.bf16.xpose.msra.mxu0 %v2386_v25  ;;  %2194 = vmatpush3.bf16.xpose.msra.mxu1 %v2387_v26 }
 0x402   :  { %2177 = vmatprep.subr.bf16.mxu0 %v2388_v27  ;;  %2195 = vmatprep.subr.bf16.mxu1 %v2389_v28 }
 0x409   :  { %2178 = vmatpush3.bf16.xpose.msra.mxu0 %v2390_v29  ;;  %2196 = vmatpush3.bf16.xpose.msra.mxu1 %v2391_v30 }
 0x40a   :  { %2179 = vmatprep.subr.bf16.mxu0 %v2392_v31  ;;  %2197 = vmatprep.subr.bf16.mxu1 %v2393_v32 }
 0x411   :  { %2180 = vmatpush3.bf16.xpose.msra.mxu0 %v2394_v33  ;;  %2198 = vmatpush3.bf16.xpose.msra.mxu1 %v2395_v34 }
 0x412   :  { %2181 = vmatprep.subr.bf16.mxu0 %v2396_v35  ;;  %2199 = vmatprep.subr.bf16.mxu1 %v2397_v36 }
 0x419   :  { %2182 = vmatpush3.bf16.xpose.msra.mxu0 %v2398_v37  ;;  %2200 = vmatpush3.bf16.xpose.msra.mxu1 %v2399_v38 }
 0x41a   :  { %2183 = vmatprep.subr.bf16.mxu0 %v2400_v39  ;;  %2201 = vmatprep.subr.bf16.mxu1 %v2401_v40 }
 0x421   :  { %2184 = vmatpush3.bf16.xpose.msra.mxu0 %v2402_v41  ;;  %2202 = vmatpush3.bf16.xpose.msra.mxu1 %v2403_v42 }
 0x428   :  { %2186 = vmatmul.mubr.msk.bf16.vlgmr.msra.gmra.mxu0 %vm2598_vm3, %v2639_v10  ;;  %2204 = vmatmul.mubr.msk.bf16.vlgmr.msra.gmra.mxu1 %vm2598_vm3, %v2639_v10 }
 0x429   :  { %2475 = shalt.err (!%p2472_p5)
}
 0x42a   :  { %s2523_s25 = smov 128   ;;  %s2524_s26 = smov 8  }
 0x42b   :  { %1818 = dma.vmem_to_hbm [thread:$0]  %s1813_s23, 256, %s2680_s6, [#allocation4], %s2523_s25, %s2523_s25, %s2524_s26  }
 0x42c   :  { %s2525_s6 = smov [#allocation9]  }
 0x42d   :  { %s1824_s29 = sshll.u32 %s2525_s6, 4  ;;  %s1825_s29 = int_to_ptr.vmem [resolvable:$true] %s1824_s29 }
 0x42e   :  { %s2484_s30 = scalar_lea.vmem %s1825_s29, 1024  ;;  %p2489_p7 = scmp.lt.s32.totalorder %s1825_s29, %s1825_s29 }
 0x42f   :  { %p2485_p6 = scmp.ne.s32.totalorder %s1825_s29, %s2484_s30  ;;  %p2490_p8 = scmp.lt.s32.totalorder %s2484_s30, %s2484_s30 }
 0x431   :  { %p2491_p9 = por %p2490_p8, %p2489_p7 }
 0x433   :  { %p2492_p10 = pnand %p2491_p9, %p2485_p6 }
 0x4a8   :  { %v1613_v43 = vpop.f32.mrf.mxu0  ;;  %v1656_v44 = vpop.f32.mrf.mxu1 }
 0x4aa   :  { %v1615_v63 = vpop.f32.mrf.mxu0  ;;  %v1658_v45 = vpop.f32.mrf.mxu1 }
 0x4ab   :  { %v2019_v46 = vpack.c.bf16 %v1615_v63, %v1613_v43  ;;  %v2020_v47 = vpack.c.bf16 %v1658_v45, %v1656_v44 }
 0x4ac   :  { %v1617_v48 = vpop.f32.mrf.mxu0  ;;  %v1660_v49 = vpop.f32.mrf.mxu1 }
 0x4ad   :  { %1799 = vst [vmem:[#allocation9] sm:$0xff] %v2019_v46  ;;  %1800 = vst [vmem:[#allocation9 + $0x8] sm:$0xff] %v2020_v47 }
 0x4ae   :  { %v1619_v50 = vpop.f32.mrf.mxu0  ;;  %v1662_v51 = vpop.f32.mrf.mxu1 }
 0x4af   :  { %v2023_v52 = vpack.c.bf16 %v1619_v50, %v1617_v48  ;;  %v2024_v53 = vpack.c.bf16 %v1662_v51, %v1660_v49 }
 0x4b1   :  { %1803 = vst [vmem:[#allocation9 + $0x20] sm:$0xff] %v2023_v52  ;;  %1804 = vst [vmem:[#allocation9 + $0x28] sm:$0xff] %v2024_v53 }
 0x4e8   :  { %v1699_v54 = vpop.f32.mrf.mxu0  ;;  %v1742_v55 = vpop.f32.mrf.mxu1 }
 0x4ea   :  { %v1701_v56 = vpop.f32.mrf.mxu0  ;;  %v1744_v57 = vpop.f32.mrf.mxu1 }
 0x4eb   :  { %v2021_v58 = vpack.c.bf16 %v1701_v56, %v1699_v54  ;;  %v2022_v59 = vpack.c.bf16 %v1744_v57, %v1742_v55 }
 0x4ec   :  { %v1703_v60 = vpop.f32.mrf.mxu0  ;;  %v1746_v17 = vpop.f32.mrf.mxu1 }
 0x4ed   :  { %1801 = vst [vmem:[#allocation9 + $0x10] sm:$0xff] %v2021_v58  ;;  %1802 = vst [vmem:[#allocation9 + $0x18] sm:$0xff] %v2022_v59 }
 0x4ee   :  { %v1705_v61 = vpop.f32.mrf.mxu0  ;;  %v1748_v62 = vpop.f32.mrf.mxu1 }
 0x4ef   :  { %v2025_v0 = vpack.c.bf16 %v1705_v61, %v1703_v60  ;;  %v2026_v1 = vpack.c.bf16 %v1748_v62, %v1746_v17 }
 0x4f1   :  { %1805 = vst [vmem:[#allocation9 + $0x30] sm:$0xff] %v2025_v0  ;;  %1806 = vst [vmem:[#allocation9 + $0x38] sm:$0xff] %v2026_v1 }
 0x4f2   :  { %2495 = shalt.err (!%p2492_p10)
}
 0x4f3   :  { %1830 = dma.vmem_to_hbm [thread:$0]  %s1825_s29, 1024, %s2681_s7, [#allocation10], %s2516_s11, %s2516_s11, %s2517_s12  }
 0x4f4   :  { %2508 = dma.done.wait [#allocation4], 256  }
 0x4f5   :  { %2509 = vsyncadd [#allocation4], 4294967040 }
 0x4f6   :  { %2510 = dma.done.wait [#allocation10], 1024  }
 0x4f7   :  { %2511 = vsyncadd [#allocation10], 4294966272 }
 0x4f8   :  { %1837 = vsyncpa [#allocation3], 1 }
 0x4f9   :  { %1838 = vsyncpa [#allocation6], 1 }
 0x4fa   :  { %1839 = vsyncpa [#allocation4], 1 }
 0x4fb   :  { %1840 = vsyncpa [#allocation10], 1 }

</bundles_post_ra>
